<compile_context>
chip_gen: v5e
topology: v5e:2x2
jax: 0.10.0
libtpu: 0.0.40
codegen_flags: <defaults>
</compile_context>

<pallas_src>
import functools

import jax
import jax.numpy as jnp
from jax.experimental import pallas as pl
from jax.experimental.pallas import tpu as pltpu


def classifier_kernel(x_ref, w1_ref, b1_ref, w2_ref, b2_ref, w3_ref, b3_ref, o_ref):
    # x / weights arrive in bf16; accumulation and the bias+ReLU epilogues are f32.
    x = x_ref[...]                                                          # (TB, F) bf16
    h1 = jnp.dot(x, w1_ref[...], preferred_element_type=jnp.float32) + b1_ref[...]
    h1 = jnp.maximum(h1, 0.0).astype(jnp.bfloat16)                          # (TB, F//2)
    h2 = jnp.dot(h1, w2_ref[...], preferred_element_type=jnp.float32) + b2_ref[...]
    h2 = jnp.maximum(h2, 0.0).astype(jnp.bfloat16)                          # (TB, F//8)
    # cls3: the `features` contribution is pre-folded into b3 (constant row);
    # w3 is the h2-part of the original weight, lane-padded to 128.
    y = jnp.dot(h2, w3_ref[...], preferred_element_type=jnp.float32) + b3_ref[...]
    o_ref[...] = y.astype(o_ref.dtype)                                      # bf16 store


def _round_up(v, m):
    return -(-v // m) * m


def _pad_lanes(a, n_pad):
    """Zero-pad the last (lane) axis of a 2-D array to n_pad columns."""
    r, c = a.shape
    if c == n_pad:
        return a
    return jnp.zeros((r, n_pad), a.dtype).at[:, :c].set(a)


@functools.partial(jax.jit, static_argnames=("block_b",))
def classifier_forward(x, features, params, *, block_b=None):
    """x: (B, in_features) f32; features: (1, 2) f32. Returns (B, out_features) f32."""
    B, F = x.shape
    out_features = params["b3"].shape[-1]

    # Fold the constant features path into the bias (kept in f32):
    #   cat([h2, feat]) @ W3 + b3 == h2 @ W3a + (features @ W3b + b3)
    b3_eff = features.astype(jnp.float32) @ params["w3b"] + params["b3"]    # (1, out)

    # Lane-pad the final layer to a multiple of 128 -> unmasked output stores.
    n_pad = _round_up(max(out_features, 128), 128)
    w3_p = _pad_lanes(params["w3a"], n_pad)
    b3_p = _pad_lanes(b3_eff, n_pad)

    # bf16 for streamed x and resident weights; biases stay f32 (epilogue in f32).
    x_b = x.astype(jnp.bfloat16)
    w1 = params["w1"].astype(jnp.bfloat16)
    w2 = params["w2"].astype(jnp.bfloat16)
    w3_b = w3_p.astype(jnp.bfloat16)
    b1, b2 = params["b1"], params["b2"]

    # Batch tile: aim for >= 2 grid steps (v7x megacore) while amortizing the
    # ~0.35 us per-step overhead. v6e (128 MiB VMEM) could use 1024 for huge B.
    if block_b is None:
        if B <= 8:
            block_b = B
        else:
            block_b = min(512, _round_up(pl.cdiv(B, 2), 8))
    grid = (pl.cdiv(B, block_b),)

    # Explicit VMEM budget: 2x buffered x/out tiles + resident weights/biases.
    streamed_bytes = 2 * block_b * F * 2 + 2 * block_b * n_pad * 2
    resident_bytes = ((w1.size + w2.size + w3_b.size) * 2
                      + (b1.size + b2.size + b3_p.size) * 4)
    vmem_limit = int(min(64 << 20, max(32 << 20, 2 * (streamed_bytes + resident_bytes))))

    # Single-buffer the resident weights only when they are big enough to matter
    # for VMEM (v7x: 64 MiB physical / 32 MiB scoped default). At tiny F the
    # extra buffer is free and the plain spec is used.
    single_buffer = resident_bytes > (4 << 20)

    def resident(a):
        if single_buffer:
            return pl.BlockSpec(a.shape, lambda i: (0, 0),
                                pipeline_mode=pl.Buffered(1))
        return pl.BlockSpec(a.shape, lambda i: (0, 0))

    out = pl.pallas_call(
        classifier_kernel,
        out_shape=jax.ShapeDtypeStruct((B, n_pad), jnp.bfloat16),
        grid=grid,
        in_specs=[
            pl.BlockSpec((block_b, F), lambda i: (i, 0)),        # streamed x tile
            resident(w1), resident(b1),
            resident(w2), resident(b2),
            resident(w3_b), resident(b3_p),
        ],
        out_specs=pl.BlockSpec((block_b, n_pad), lambda i: (i, 0)),
        compiler_params=pltpu.CompilerParams(
            dimension_semantics=("parallel",),                   # batch across TCs (v7x)
            vmem_limit_bytes=vmem_limit),
    )(x_b, w1, b1, w2, b2, w3_b, b3_p)

    return out[:, :out_features].astype(x.dtype)


def init_params(key, in_features, out_features):
    """Deterministic synthetic parameters, stored as (in, out) matrices (W^T)."""
    h1 = in_features // 2
    h2 = in_features // 8
    c3_in = h2 + 2
    ks = jax.random.split(key, 6)

    def lin(kw, kb, fan_in, fan_out):
        bound = 1.0 / jnp.sqrt(fan_in)
        w = jax.random.uniform(kw, (fan_in, fan_out), jnp.float32, -bound, bound)
        b = jax.random.uniform(kb, (1, fan_out), jnp.float32, -bound, bound)
        return w, b

    w1, b1 = lin(ks[0], ks[1], in_features, h1)
    w2, b2 = lin(ks[2], ks[3], h1, h2)
    w3, b3 = lin(ks[4], ks[5], c3_in, out_features)
    # Split cls3 weight along its input axis: first h2 rows act on h2, last 2 on features.
    w3a, w3b = w3[:h2, :], w3[h2:, :]
    return dict(w1=w1, b1=b1, w2=w2, b2=b2, w3a=w3a, w3b=w3b, b3=b3)


def reference_forward(x, features, params):
    h1 = jnp.maximum(x @ params["w1"] + params["b1"], 0.0)
    h2 = jnp.maximum(h1 @ params["w2"] + params["b2"], 0.0)
    feat = jnp.broadcast_to(features, (x.shape[0], features.shape[1]))
    cat = jnp.concatenate([h2, feat], axis=1)
    w3 = jnp.concatenate([params["w3a"], params["w3b"]], axis=0)
    return cat @ w3 + params["b3"]


if __name__ == "__main__":
    in_features = 32      # -> hidden1=16, hidden2=4, cls3_in=6
    out_features = 4
    batch = 8

    key = jax.random.PRNGKey(0)
    k_x, k_f, k_p = jax.random.split(key, 3)
    x = jax.random.normal(k_x, (batch, in_features), jnp.float32)
    features = jax.random.normal(k_f, (1, 2), jnp.float32)
    params = init_params(k_p, in_features, out_features)

    y = classifier_forward(x, features, params)
    y = jax.block_until_ready(y)

    y_ref = reference_forward(x, features, params)
    assert y.shape == (batch, out_features)
    # bf16 streams/storage -> looser tolerance than the pure-f32 version.
    assert jnp.allclose(y, y_ref, atol=5e-2, rtol=5e-2), "mismatch vs JAX reference"

    print("KERNEL_OK")
</pallas_src>

<mosaic_0001>
module attributes {stable_mosaic.version = 11 : i64} {
  func.func @classifier_kernel(%arg0: i32, %arg1: memref<8x32xbf16, #tpu.memory_space<vmem>>, %arg2: memref<32x16xbf16, #tpu.memory_space<vmem>>, %arg3: memref<1x16xf32, #tpu.memory_space<vmem>>, %arg4: memref<16x4xbf16, #tpu.memory_space<vmem>>, %arg5: memref<1x4xf32, #tpu.memory_space<vmem>>, %arg6: memref<4x128xbf16, #tpu.memory_space<vmem>>, %arg7: memref<1x128xf32, #tpu.memory_space<vmem>>, %arg8: memref<8x128xbf16, #tpu.memory_space<vmem>>) attributes {dimension_semantics = [#tpu.dimension_semantics<parallel>], iteration_bounds = array<i64: 1>, scalar_prefetch = 0 : i64, scratch_operands = 0 : i64, tpu.core_type = #tpu.core_type<tc>, window_params = [{transform_indices = @transform_0, window_bounds = array<i64: 8, 32>}, {pipeline_mode = #tpu.pipeline_mode<synchronous>, transform_indices = @transform_1, window_bounds = array<i64: 32, 16>}, {pipeline_mode = #tpu.pipeline_mode<synchronous>, transform_indices = @transform_2, window_bounds = array<i64: 1, 16>}, {pipeline_mode = #tpu.pipeline_mode<synchronous>, transform_indices = @transform_3, window_bounds = array<i64: 16, 4>}, {pipeline_mode = #tpu.pipeline_mode<synchronous>, transform_indices = @transform_4, window_bounds = array<i64: 1, 4>}, {pipeline_mode = #tpu.pipeline_mode<synchronous>, transform_indices = @transform_5, window_bounds = array<i64: 4, 128>}, {pipeline_mode = #tpu.pipeline_mode<synchronous>, transform_indices = @transform_6, window_bounds = array<i64: 1, 128>}, {transform_indices = @transform_7, window_bounds = array<i64: 8, 128>}]} {
    %c0 = arith.constant 0 : index
    %c0_0 = arith.constant 0 : index
    %0 = vector.load %arg1[%c0, %c0_0] : memref<8x32xbf16, #tpu.memory_space<vmem>>, vector<8x32xbf16>
    %c0_1 = arith.constant 0 : index
    %c0_2 = arith.constant 0 : index
    %1 = vector.load %arg2[%c0_1, %c0_2] : memref<32x16xbf16, #tpu.memory_space<vmem>>, vector<32x16xbf16>
    %cst = arith.constant dense<0.000000e+00> : vector<8x16xf32>
    %2 = tpu.matmul %0, %1, %cst {dimension_numbers = #tpu.dot_dimension_numbers<[1], [0], [0], [1], [0, 0, 1, 1], [], []>} : vector<8x32xbf16>, vector<32x16xbf16>, vector<8x16xf32> -> vector<8x16xf32>
    %c0_3 = arith.constant 0 : index
    %c0_4 = arith.constant 0 : index
    %3 = vector.load %arg3[%c0_3, %c0_4] : memref<1x16xf32, #tpu.memory_space<vmem>>, vector<1x16xf32>
    %4 = vector.broadcast %3 : vector<1x16xf32> to vector<8x16xf32>
    %5 = arith.addf %2, %4 : vector<8x16xf32>
    %cst_5 = arith.constant 0.000000e+00 : f32
    %6 = vector.broadcast %cst_5 : f32 to vector<8x16xf32>
    %7 = arith.maximumf %5, %6 : vector<8x16xf32>
    %8 = arith.truncf %7 : vector<8x16xf32> to vector<8x16xbf16>
    %c0_6 = arith.constant 0 : index
    %c0_7 = arith.constant 0 : index
    %9 = vector.load %arg4[%c0_6, %c0_7] : memref<16x4xbf16, #tpu.memory_space<vmem>>, vector<16x4xbf16>
    %cst_8 = arith.constant dense<0.000000e+00> : vector<8x4xf32>
    %10 = tpu.matmul %8, %9, %cst_8 {dimension_numbers = #tpu.dot_dimension_numbers<[1], [0], [0], [1], [0, 0, 1, 1], [], []>} : vector<8x16xbf16>, vector<16x4xbf16>, vector<8x4xf32> -> vector<8x4xf32>
    %c0_9 = arith.constant 0 : index
    %c0_10 = arith.constant 0 : index
    %11 = vector.load %arg5[%c0_9, %c0_10] : memref<1x4xf32, #tpu.memory_space<vmem>>, vector<1x4xf32>
    %12 = vector.broadcast %11 : vector<1x4xf32> to vector<8x4xf32>
    %13 = arith.addf %10, %12 : vector<8x4xf32>
    %cst_11 = arith.constant 0.000000e+00 : f32
    %14 = vector.broadcast %cst_11 : f32 to vector<8x4xf32>
    %15 = arith.maximumf %13, %14 : vector<8x4xf32>
    %16 = arith.truncf %15 : vector<8x4xf32> to vector<8x4xbf16>
    %c0_12 = arith.constant 0 : index
    %c0_13 = arith.constant 0 : index
    %17 = vector.load %arg6[%c0_12, %c0_13] : memref<4x128xbf16, #tpu.memory_space<vmem>>, vector<4x128xbf16>
    %cst_14 = arith.constant dense<0.000000e+00> : vector<8x128xf32>
    %18 = tpu.matmul %16, %17, %cst_14 {dimension_numbers = #tpu.dot_dimension_numbers<[1], [0], [0], [1], [0, 0, 1, 1], [], []>} : vector<8x4xbf16>, vector<4x128xbf16>, vector<8x128xf32> -> vector<8x128xf32>
    %c0_15 = arith.constant 0 : index
    %c0_16 = arith.constant 0 : index
    %19 = vector.load %arg7[%c0_15, %c0_16] : memref<1x128xf32, #tpu.memory_space<vmem>>, vector<1x128xf32>
    %20 = vector.broadcast %19 : vector<1x128xf32> to vector<8x128xf32>
    %21 = arith.addf %18, %20 : vector<8x128xf32>
    %22 = arith.truncf %21 : vector<8x128xf32> to vector<8x128xbf16>
    %c0_17 = arith.constant 0 : index
    %c0_18 = arith.constant 0 : index
    %23 = vector.load %arg8[%c0_17, %c0_18] : memref<8x128xbf16, #tpu.memory_space<vmem>>, vector<8x128xbf16>
    tpu.vector_store %arg8[%c0_17, %c0_18], %22 {strides = array<i32>} : memref<8x128xbf16, #tpu.memory_space<vmem>>, vector<8x128xbf16>,
    return
  }
  func.func @transform_0(%arg0: i32) -> (i32, i32) {
    %c0_i32 = arith.constant 0 : i32
    %c0_i32_0 = arith.constant 0 : i32
    return %arg0, %c0_i32 : i32, i32
  }
  func.func @transform_1(%arg0: i32) -> (i32, i32) {
    %c0_i32 = arith.constant 0 : i32
    %c0_i32_0 = arith.constant 0 : i32
    %c0_i32_1 = arith.constant 0 : i32
    return %c0_i32, %c0_i32_0 : i32, i32
  }
  func.func @transform_2(%arg0: i32) -> (i32, i32) {
    %c0_i32 = arith.constant 0 : i32
    %c0_i32_0 = arith.constant 0 : i32
    %c0_i32_1 = arith.constant 0 : i32
    return %c0_i32, %c0_i32_0 : i32, i32
  }
  func.func @transform_3(%arg0: i32) -> (i32, i32) {
    %c0_i32 = arith.constant 0 : i32
    %c0_i32_0 = arith.constant 0 : i32
    %c0_i32_1 = arith.constant 0 : i32
    return %c0_i32, %c0_i32_0 : i32, i32
  }
  func.func @transform_4(%arg0: i32) -> (i32, i32) {
    %c0_i32 = arith.constant 0 : i32
    %c0_i32_0 = arith.constant 0 : i32
    %c0_i32_1 = arith.constant 0 : i32
    return %c0_i32, %c0_i32_0 : i32, i32
  }
  func.func @transform_5(%arg0: i32) -> (i32, i32) {
    %c0_i32 = arith.constant 0 : i32
    %c0_i32_0 = arith.constant 0 : i32
    %c0_i32_1 = arith.constant 0 : i32
    return %c0_i32, %c0_i32_0 : i32, i32
  }
  func.func @transform_6(%arg0: i32) -> (i32, i32) {
    %c0_i32 = arith.constant 0 : i32
    %c0_i32_0 = arith.constant 0 : i32
    %c0_i32_1 = arith.constant 0 : i32
    return %c0_i32, %c0_i32_0 : i32, i32
  }
  func.func @transform_7(%arg0: i32) -> (i32, i32) {
    %c0_i32 = arith.constant 0 : i32
    %c0_i32_0 = arith.constant 0 : i32
    return %arg0, %c0_i32 : i32, i32
  }
}

</mosaic_0001>

<bundles_post_ra>
// kernel: classifier_forward.1
= control target key start
LH: loop header
LB: loop body
LE: loop exit
PB: predicated region body
PF: predicated region fallthrough
CT: control target
= control target key end

     0   :  { %vm48_vm0 = vcmask 261120   ;;  %vm79_vm1 = vcmask 130048   ;;  %vm107_vm2 = vcmask 1041408   ;;  %vm103_vm3 = vcmask 31744   ;;  %s218_s1 = inlined_call_operand.vmem [shape: bf16[32,16], index: 1, kind: input, shape index: {}]   ;;  %s219_s2 = inlined_call_operand.vmem [shape: f32[1,16], index: 2, kind: input, shape index: {}]   ;;  %s220_s0 = inlined_call_operand.vmem [shape: bf16[8,32], index: 0, kind: input, shape index: {}]   ;;  %s221_s4 = inlined_call_operand.vmem [shape: f32[1,4], index: 4, kind: input, shape index: {}]   ;;  %s222_s3 = inlined_call_operand.vmem [shape: bf16[16,4], index: 3, kind: input, shape index: {}]   ;;  %s223_s6 = inlined_call_operand.vmem [shape: f32[1,128], index: 6, kind: input, shape index: {}]   ;;  %s224_s5 = inlined_call_operand.vmem [shape: bf16[4,128], index: 5, kind: input, shape index: {}]   ;;  %s225_s7 = inlined_call_operand.vmem [shape: bf16[8,128], index: 7, kind: output, shape index: {}]  }
   0x1   :  { %v146_v0 = vld [vmem:[%s218_s1 + $0x8] sm:$0xff]  ;;  %v145_v1 = vld [vmem:[%s218_s1] sm:$0xff] }
   0x2   :  { %58 = vmatpush.bf16.msra.mxu0 %v146_v0  ;;  %v27_v2 = vld [vmem:[%s220_s0] sm:$0xf] }
   0x3   :  { %v147_v3 = vld [vmem:[%s222_s3] sm:$0xff] }
   0x4   :  { %90 = vmatpush.bf16.msra.mxu1 %v147_v3  ;;  %v148_v4 = vld [vmem:[%s219_s2] ss:$0 sm:$0xff] }
   0x5   :  { %v98_v10 = vld [vmem:[%s224_s5] sm:$0x3] }
   0x6   :  { %59 = vmatpush.bf16.msra.mxu0 %v145_v1  ;;  %v109_v11 = vsel %vm107_vm2, %v98_v10, 0  ;;  %v149_v12 = vld [vmem:[%s221_s4] ss:$0 sm:$0xff] }
   0x7   :  { %118 = vmatpush.bf16.msra.mxu2 %v109_v11  ;;  %v150_v18 = vld [vmem:[%s223_s6] ss:$0 sm:$0xff] }
   0x9   :  { %138 = vmatmul.msk.bf16.vlgmr.msra.gmra.mxu0 %vm48_vm0, %v27_v2 }
  0x86   :  { %v61_v5 = vpop.f32.mrf.mxu0 }
  0x87   :  { %v62_v6 = vadd.f32 %v148_v4, %v61_v5 }
  0x89   :  { %v65_v7 = vmax.f32 %v62_v6, 0.0 }
  0x8b   :  { %v66_v8 = vpack.c.bf16 %v65_v7, %v65_v7 }
  0x8d   :  { %143 = vmatmul.msk.bf16.vlgmr.msra.gmra.mxu1 %vm79_vm1, %v66_v8 }
  0x8e   :  { %v63_v9 = vpop.f32.mrf.mxu0 }
 0x10a   :  { %v92_v13 = vpop.f32.mrf.mxu1 }
 0x10b   :  { %v93_v14 = vadd.f32 %v149_v12, %v92_v13 }
 0x10d   :  { %v96_v15 = vmax.f32 %v93_v14, 0.0 }
 0x10f   :  { %v97_v16 = vpack.c.bf16 %v96_v15, %v96_v15 }
 0x111   :  { %144 = vmatmul.msk.bf16.vlgmr.msra.gmra.mxu2 %vm103_vm3, %v97_v16 }
 0x112   :  { %v94_v17 = vpop.f32.mrf.mxu1 }
 0x194   :  { %v120_v19 = vpop.f32.mrf.mxu2 }
 0x195   :  { %v121_v20 = vadd.f32 %v150_v18, %v120_v19 }
 0x197   :  { %v124_v21 = vpack.c.bf16 %v121_v20, %v121_v20 }
 0x199   :  { %125 = vst [vmem:[%s225_s7] sm:$0xf] %v124_v21 }
 0x19c   :  { %v122_v22 = vpop.f32.mrf.mxu2 }

</bundles_post_ra>
